<compile_context>
chip_gen: v6e
topology: v6e:2x2x1
jax: 0.10.0
libtpu: 0.0.40
codegen_flags: <defaults>
</compile_context>

<pallas_src>
import functools

import jax
import jax.numpy as jnp
from jax.experimental import pallas as pl
from jax.experimental.pallas import tpu as pltpu


def _round_up(x, m):
    return (x + m - 1) // m * m


def mlp_kernel(x_ref, w1_ref, b1_ref, w2_ref, b2_ref, o_ref):
    # Layer 1: cast the streamed f32 tile to bf16 for the MXU; f32 accumulation.
    x = x_ref[...].astype(jnp.bfloat16)                      # (TB, 784)
    h = jnp.dot(x, w1_ref[...], preferred_element_type=jnp.float32)
    h = jnp.maximum(h + b1_ref[...], 0.0)                     # bias + ReLU in f32
    # Layer 2: bf16 MXU matmul, f32 accumulate + bias, f32 lane-dense store.
    y = jnp.dot(h.astype(jnp.bfloat16), w2_ref[...],
                preferred_element_type=jnp.float32)
    o_ref[...] = (y + b2_ref[...]).astype(o_ref.dtype)


@functools.partial(jax.jit, static_argnames=("block_b",))
def mlp_forward(x, w1, b1, w2, b2, *, block_b=1024):
    """x: (B, C, H, W) float32.  Returns logits (B, 10) float32."""
    B = x.shape[0]
    x2 = x.reshape(B, -1).astype(jnp.float32)                 # (B, 784), like .view
    K = x2.shape[1]
    H = w1.shape[1]
    O = w2.shape[1]
    O_pad = _round_up(O, 128)                                 # 10 -> 128 lane-dense out

    # Batch tile: sublane-aligned (multiple of 8) unless it covers the whole batch.
    TB = min(block_b, _round_up(B, 8))
    B_pad = _round_up(B, TB)
    if B_pad != B:
        # Only pads when needed (tiny batches / ragged last tile); zero rows are
        # correctness-neutral and sliced away below.
        x2 = jnp.zeros((B_pad, K), x2.dtype).at[:B].set(x2)

    # Weights/biases are tiny (<100 KiB total): cast/pad once in the wrapper.
    w1_b = w1.astype(jnp.bfloat16)                            # (784, H)
    b1_r = b1.reshape(1, H).astype(jnp.float32)
    w2_p = jnp.zeros((H, O_pad), jnp.bfloat16).at[:, :O].set(w2.astype(jnp.bfloat16))
    b2_p = jnp.zeros((1, O_pad), jnp.float32).at[:, :O].set(b2.astype(jnp.float32))

    grid = (B_pad // TB,)
    cost = pl.CostEstimate(
        flops=2 * B_pad * (K * H + H * O_pad),
        transcendentals=0,
        bytes_accessed=(x2.size * 4 + w1_b.size * 2 + w2_p.size * 2
                        + b1_r.size * 4 + b2_p.size * 4 + B_pad * O_pad * 4),
    )

    out = pl.pallas_call(
        mlp_kernel,
        out_shape=jax.ShapeDtypeStruct((B_pad, O_pad), jnp.float32),
        grid=grid,
        in_specs=[
            # x streams through VMEM, one batch tile per grid step (double-buffered).
            pl.BlockSpec((TB, K), lambda i: (i, 0)),
            # Weights / biases: constant index_map -> fetched once, VMEM-resident.
            pl.BlockSpec((K, H), lambda i: (0, 0)),
            pl.BlockSpec((1, H), lambda i: (0, 0)),
            pl.BlockSpec((H, O_pad), lambda i: (0, 0)),
            pl.BlockSpec((1, O_pad), lambda i: (0, 0)),
        ],
        out_specs=pl.BlockSpec((TB, O_pad), lambda i: (i, 0)),
        compiler_params=pltpu.CompilerParams(
            dimension_semantics=("parallel",),                # shard tiles across TCs
            vmem_limit_bytes=32 * 1024 * 1024),
        cost_estimate=cost,
    )(x2, w1_b, b1_r, w2_p, b2_p)

    return out[:B, :O]


def init_params(key, in_features=784, hidden_size=32, out_features=10):
    # Deterministic init mimicking nn.Linear's U(-1/sqrt(fan_in), 1/sqrt(fan_in)).
    k1, k2, k3, k4 = jax.random.split(key, 4)
    lim1 = 1.0 / jnp.sqrt(in_features)
    lim2 = 1.0 / jnp.sqrt(hidden_size)
    w1 = jax.random.uniform(k1, (in_features, hidden_size), jnp.float32, -lim1, lim1)
    b1 = jax.random.uniform(k2, (hidden_size,), jnp.float32, -lim1, lim1)
    w2 = jax.random.uniform(k3, (hidden_size, out_features), jnp.float32, -lim2, lim2)
    b2 = jax.random.uniform(k4, (out_features,), jnp.float32, -lim2, lim2)
    return w1, b1, w2, b2


if __name__ == "__main__":
    key = jax.random.PRNGKey(0)
    kx, kp = jax.random.split(key)

    B, C, H, W = 2, 1, 28, 28            # MNIST-like: C*H*W = 784
    hidden_size = 32
    x = jax.random.normal(kx, (B, C, H, W), dtype=jnp.float32)
    w1, b1, w2, b2 = init_params(kp, in_features=C * H * W, hidden_size=hidden_size)

    out = mlp_forward(x, w1, b1, w2, b2)
    out = jax.block_until_ready(out)

    # Pure-JAX f32 reference.  bf16 weights/activations (f32 accumulation) in the
    # kernel -> loosened tolerance.
    xf = x.reshape(B, -1)
    ref = jnp.maximum(xf @ w1 + b1, 0.0) @ w2 + b2
    assert out.shape == (B, 10)
    assert jnp.allclose(out, ref, atol=2e-2, rtol=2e-2), (
        jnp.max(jnp.abs(out - ref)))

    print("KERNEL_OK")
</pallas_src>

<mosaic_0001>
module attributes {stable_mosaic.version = 11 : i64} {
  func.func @mlp_kernel(%arg0: i32, %arg1: memref<8x784xf32, #tpu.memory_space<vmem>>, %arg2: memref<784x32xbf16, #tpu.memory_space<vmem>>, %arg3: memref<1x32xf32, #tpu.memory_space<vmem>>, %arg4: memref<32x128xbf16, #tpu.memory_space<vmem>>, %arg5: memref<1x128xf32, #tpu.memory_space<vmem>>, %arg6: memref<8x128xf32, #tpu.memory_space<vmem>>) attributes {dimension_semantics = [#tpu.dimension_semantics<parallel>], iteration_bounds = array<i64: 1>, scalar_prefetch = 0 : i64, scratch_operands = 0 : i64, tpu.core_type = #tpu.core_type<tc>, window_params = [{transform_indices = @transform_0, window_bounds = array<i64: 8, 784>}, {pipeline_mode = #tpu.pipeline_mode<synchronous>, transform_indices = @transform_1, window_bounds = array<i64: 784, 32>}, {pipeline_mode = #tpu.pipeline_mode<synchronous>, transform_indices = @transform_2, window_bounds = array<i64: 1, 32>}, {pipeline_mode = #tpu.pipeline_mode<synchronous>, transform_indices = @transform_3, window_bounds = array<i64: 32, 128>}, {pipeline_mode = #tpu.pipeline_mode<synchronous>, transform_indices = @transform_4, window_bounds = array<i64: 1, 128>}, {transform_indices = @transform_5, window_bounds = array<i64: 8, 128>}]} {
    %c0 = arith.constant 0 : index
    %c0_0 = arith.constant 0 : index
    %0 = vector.load %arg1[%c0, %c0_0] : memref<8x784xf32, #tpu.memory_space<vmem>>, vector<8x784xf32>
    %1 = arith.truncf %0 : vector<8x784xf32> to vector<8x784xbf16>
    %c0_1 = arith.constant 0 : index
    %c0_2 = arith.constant 0 : index
    %2 = vector.load %arg2[%c0_1, %c0_2] : memref<784x32xbf16, #tpu.memory_space<vmem>>, vector<784x32xbf16>
    %cst = arith.constant dense<0.000000e+00> : vector<8x32xf32>
    %3 = tpu.matmul %1, %2, %cst {dimension_numbers = #tpu.dot_dimension_numbers<[1], [0], [0], [1], [0, 0, 1, 1], [], []>} : vector<8x784xbf16>, vector<784x32xbf16>, vector<8x32xf32> -> vector<8x32xf32>
    %c0_3 = arith.constant 0 : index
    %c0_4 = arith.constant 0 : index
    %4 = vector.load %arg3[%c0_3, %c0_4] : memref<1x32xf32, #tpu.memory_space<vmem>>, vector<1x32xf32>
    %5 = vector.broadcast %4 : vector<1x32xf32> to vector<8x32xf32>
    %6 = arith.addf %3, %5 : vector<8x32xf32>
    %cst_5 = arith.constant 0.000000e+00 : f32
    %7 = vector.broadcast %cst_5 : f32 to vector<8x32xf32>
    %8 = arith.maximumf %6, %7 : vector<8x32xf32>
    %9 = arith.truncf %8 : vector<8x32xf32> to vector<8x32xbf16>
    %c0_6 = arith.constant 0 : index
    %c0_7 = arith.constant 0 : index
    %10 = vector.load %arg4[%c0_6, %c0_7] : memref<32x128xbf16, #tpu.memory_space<vmem>>, vector<32x128xbf16>
    %cst_8 = arith.constant dense<0.000000e+00> : vector<8x128xf32>
    %11 = tpu.matmul %9, %10, %cst_8 {dimension_numbers = #tpu.dot_dimension_numbers<[1], [0], [0], [1], [0, 0, 1, 1], [], []>} : vector<8x32xbf16>, vector<32x128xbf16>, vector<8x128xf32> -> vector<8x128xf32>
    %c0_9 = arith.constant 0 : index
    %c0_10 = arith.constant 0 : index
    %12 = vector.load %arg5[%c0_9, %c0_10] : memref<1x128xf32, #tpu.memory_space<vmem>>, vector<1x128xf32>
    %13 = vector.broadcast %12 : vector<1x128xf32> to vector<8x128xf32>
    %14 = arith.addf %11, %13 : vector<8x128xf32>
    %c0_11 = arith.constant 0 : index
    %c0_12 = arith.constant 0 : index
    %15 = vector.load %arg6[%c0_11, %c0_12] : memref<8x128xf32, #tpu.memory_space<vmem>>, vector<8x128xf32>
    tpu.vector_store %arg6[%c0_11, %c0_12], %14 {strides = array<i32>} : memref<8x128xf32, #tpu.memory_space<vmem>>, vector<8x128xf32>,
    return
  }
  func.func @transform_0(%arg0: i32) -> (i32, i32) {
    %c0_i32 = arith.constant 0 : i32
    %c0_i32_0 = arith.constant 0 : i32
    return %arg0, %c0_i32 : i32, i32
  }
  func.func @transform_1(%arg0: i32) -> (i32, i32) {
    %c0_i32 = arith.constant 0 : i32
    %c0_i32_0 = arith.constant 0 : i32
    %c0_i32_1 = arith.constant 0 : i32
    return %c0_i32, %c0_i32_0 : i32, i32
  }
  func.func @transform_2(%arg0: i32) -> (i32, i32) {
    %c0_i32 = arith.constant 0 : i32
    %c0_i32_0 = arith.constant 0 : i32
    %c0_i32_1 = arith.constant 0 : i32
    return %c0_i32, %c0_i32_0 : i32, i32
  }
  func.func @transform_3(%arg0: i32) -> (i32, i32) {
    %c0_i32 = arith.constant 0 : i32
    %c0_i32_0 = arith.constant 0 : i32
    %c0_i32_1 = arith.constant 0 : i32
    return %c0_i32, %c0_i32_0 : i32, i32
  }
  func.func @transform_4(%arg0: i32) -> (i32, i32) {
    %c0_i32 = arith.constant 0 : i32
    %c0_i32_0 = arith.constant 0 : i32
    %c0_i32_1 = arith.constant 0 : i32
    return %c0_i32, %c0_i32_0 : i32, i32
  }
  func.func @transform_5(%arg0: i32) -> (i32, i32) {
    %c0_i32 = arith.constant 0 : i32
    %c0_i32_0 = arith.constant 0 : i32
    return %arg0, %c0_i32 : i32, i32
  }
}

</mosaic_0001>

<bundles_post_ra>
// kernel: mlp_forward.1
= control target key start
LH: loop header
LB: loop body
LE: loop exit
PB: predicated region body
PF: predicated region fallthrough
CT: control target
= control target key end

     0   :  { %v865_v44 = vmov 0.0   ;;  %vm866_vm0 = vmmov 0   ;;  %vm434_vm1 = vcmask 130048   ;;  %vm623_vm2 = vcmask 261120   ;;  %s1082_s1 = inlined_call_operand.vmem [shape: bf16[784,32], index: 1, kind: input, shape index: {}]   ;;  %s1083_s0 = inlined_call_operand.vmem [shape: f32[8,784], index: 0, kind: input, shape index: {}]   ;;  %s1084_s3 = inlined_call_operand.vmem [shape: bf16[32,128], index: 3, kind: input, shape index: {}]   ;;  %s1085_s2 = inlined_call_operand.vmem [shape: f32[1,32], index: 2, kind: input, shape index: {}]   ;;  %s1086_s4 = inlined_call_operand.vmem [shape: f32[1,128], index: 4, kind: input, shape index: {}]   ;;  %s1087_s5 = inlined_call_operand.vmem [shape: f32[8,128], index: 5, kind: output, shape index: {}]  }
   0x1   :  { %v814_v0 = vld [vmem:[%s1082_s1 + $0x78] sm:$0xff]   ;;  %v818_v4 = vld [vmem:[%s1082_s1 + $0x70] sm:$0xff]   ;;  %v822_v8 = vld [vmem:[%s1082_s1 + $0x68] sm:$0xff]  }
   0x2   :  { %v815_v1 = vld [vmem:[%s1082_s1 + $0x38] sm:$0xff]   ;;  %727 = vmatprep.subr.bf16.mxu0 %v814_v0  ;;  %v819_v5 = vld [vmem:[%s1082_s1 + $0x30] sm:$0xff]   ;;  %v823_v9 = vld [vmem:[%s1082_s1 + $0x28] sm:$0xff]  }
   0x3   :  { %v816_v2 = vld [vmem:[%s1082_s1 + $0xf8] sm:$0xff]   ;;  %728 = vmatpush3.bf16.msra.mxu0 %v815_v1  ;;  %v820_v6 = vld [vmem:[%s1082_s1 + $0xf0] sm:$0xff]   ;;  %v824_v10 = vld [vmem:[%s1082_s1 + $0xe8] sm:$0xff]  }
   0x4   :  { %v817_v3 = vld [vmem:[%s1082_s1 + $0xb8] sm:$0xff]   ;;  %749 = vmatprep.subr.bf16.mxu1 %v816_v2  ;;  %729 = vmatprep.subr.bf16.mxu0 %v818_v4  ;;  %v821_v7 = vld [vmem:[%s1082_s1 + $0xb0] sm:$0xff]   ;;  %v825_v11 = vld [vmem:[%s1082_s1 + $0xa8] sm:$0xff]  }
   0x5   :  { %750 = vmatpush3.bf16.msra.mxu1 %v817_v3  ;;  %v826_v12 = vld [vmem:[%s1082_s1 + $0x60] sm:$0xff]   ;;  %v830_v16 = vld [vmem:[%s1082_s1 + $0x58] sm:$0xff]   ;;  %v834_v20 = vld [vmem:[%s1082_s1 + $0x50] sm:$0xff]  }
   0x6   :  { %751 = vmatprep.subr.bf16.mxu1 %v820_v6  ;;  %v827_v13 = vld [vmem:[%s1082_s1 + $0x20] sm:$0xff]   ;;  %v831_v17 = vld [vmem:[%s1082_s1 + $0x18] sm:$0xff]   ;;  %v835_v21 = vld [vmem:[%s1082_s1 + $0x10] sm:$0xff]  }
   0x7   :  { %730 = vmatpush3.bf16.msra.mxu0 %v819_v5  ;;  %v828_v14 = vld [vmem:[%s1082_s1 + $0xe0] sm:$0xff]   ;;  %v832_v18 = vld [vmem:[%s1082_s1 + $0xd8] sm:$0xff]   ;;  %v836_v22 = vld [vmem:[%s1082_s1 + $0xd0] sm:$0xff]  }
   0x8   :  { %731 = vmatprep.subr.bf16.mxu0 %v822_v8  ;;  %v829_v15 = vld [vmem:[%s1082_s1 + $0xa0] sm:$0xff]   ;;  %v833_v19 = vld [vmem:[%s1082_s1 + $0x98] sm:$0xff]   ;;  %v837_v23 = vld [vmem:[%s1082_s1 + $0x90] sm:$0xff]  }
   0x9   :  { %752 = vmatpush3.bf16.msra.mxu1 %v821_v7  ;;  %v838_v24 = vld [vmem:[%s1082_s1 + $0x48] sm:$0xff]   ;;  %v842_v28 = vld [vmem:[%s1082_s1 + $0x40] sm:$0xff]   ;;  %v846_v36 = vld [vmem:[%s1082_s1 + $0x178] sm:$0xff]  }
   0xa   :  { %753 = vmatprep.subr.bf16.mxu1 %v824_v10  ;;  %v839_v25 = vld [vmem:[%s1082_s1 + $0x8] sm:$0xff]   ;;  %v843_v29 = vld [vmem:[%s1082_s1] sm:$0xff]   ;;  %v24_v37 = vld [vmem:[%s1083_s0 + $0x18] sm:$0xff] }
   0xb   :  { %732 = vmatpush3.bf16.msra.mxu0 %v823_v9  ;;  %v840_v26 = vld [vmem:[%s1082_s1 + $0xc8] sm:$0xff]   ;;  %v844_v30 = vld [vmem:[%s1082_s1 + $0xc0] sm:$0xff]   ;;  %v31_v38 = vpack.c.bf16 %v24_v37, %v24_v37  ;;  %v847_v39 = vld [vmem:[%s1082_s1 + $0x138] sm:$0xff]  }
   0xc   :  { %733 = vmatprep.subr.bf16.mxu0 %v826_v12  ;;  %v841_v27 = vld [vmem:[%s1082_s1 + $0x88] sm:$0xff]   ;;  %v845_v33 = vld [vmem:[%s1082_s1 + $0x80] sm:$0xff]   ;;  %v23_v40 = vld [vmem:[%s1083_s0 + $0x10] sm:$0xff] }
   0xd   :  { %754 = vmatpush3.bf16.msra.mxu1 %v825_v11  ;;  %v22_v31 = vld [vmem:[%s1083_s0 + $0x8] sm:$0xff]  ;;  %v21_v34 = vld [vmem:[%s1083_s0] sm:$0xff]  ;;  %510 = vmatprep.mubr.bf16.mxu1 %v31_v38  ;;  %v30_v41 = vpack.c.bf16 %v23_v40, %v23_v40  ;;  %v848_v42 = vld [vmem:[%s1082_s1 + $0x170] sm:$0xff]  }
   0xe   :  { %755 = vmatprep.subr.bf16.mxu1 %v828_v14  ;;  %v29_v32 = vpack.c.bf16 %v22_v31, %v22_v31  ;;  %v28_v35 = vpack.c.bf16 %v21_v34, %v21_v34  ;;  %v849_v43 = vld [vmem:[%s1082_s1 + $0x130] sm:$0xff]   ;;  %v850_v45 = vld [vmem:[%s1082_s1 + $0x168] sm:$0xff]   ;;  %v852_v47 = vld [vmem:[%s1082_s1 + $0x160] sm:$0xff]  }
   0xf   :  { %734 = vmatpush3.bf16.msra.mxu0 %v827_v13  ;;  %v851_v46 = vld [vmem:[%s1082_s1 + $0x128] sm:$0xff]   ;;  %v853_v48 = vld [vmem:[%s1082_s1 + $0x120] sm:$0xff]   ;;  %v854_v49 = vld [vmem:[%s1082_s1 + $0x158] sm:$0xff]  }
  0x10   :  { %735 = vmatprep.subr.bf16.mxu0 %v830_v16  ;;  %470 = vmatprep.mubr.bf16.mxu0 %v29_v32  ;;  %v855_v50 = vld [vmem:[%s1082_s1 + $0x118] sm:$0xff]   ;;  %v856_v51 = vld [vmem:[%s1082_s1 + $0x150] sm:$0xff]   ;;  %v862_v52 = vld [vmem:[%s1082_s1 + $0x180] sm:$0xff]  }
  0x11   :  { %756 = vmatpush3.bf16.msra.mxu1 %v829_v15  ;;  %v26_v53 = vld [vmem:[%s1083_s0 + $0x28] sm:$0xff]  ;;  %v27_v55 = vld [vmem:[%s1083_s0 + $0x30] sm:$0xff]  ;;  %v860_v60 = vld [vmem:[%s1082_s1 + $0x140] sm:$0xff]  }
  0x12   :  { %757 = vmatprep.subr.bf16.mxu1 %v832_v18  ;;  %v33_v54 = vpack.c.bf16 %v26_v53, %v26_v53  ;;  %v857_v56 = vld [vmem:[%s1082_s1 + $0x110] sm:$0xff]   ;;  %v34_v57 = vpack.c.bf16 %v27_v55, %v27_v55  ;;  %v858_v58 = vld [vmem:[%s1082_s1 + $0x148] sm:$0xff]   ;;  %v861_v61 = vld [vmem:[%s1082_s1 + $0x100] sm:$0xff]  }
  0x13   :  { %736 = vmatpush3.bf16.msra.mxu0 %v831_v17  ;;  %v859_v59 = vld [vmem:[%s1082_s1 + $0x108] sm:$0xff]   ;;  %v25_v62 = vld [vmem:[%s1083_s0 + $0x20] sm:$0xff] }
  0x14   :  { %737 = vmatprep.subr.bf16.mxu0 %v834_v20  ;;  %v32_v63 = vpack.c.bf16 %v25_v62, %v25_v62  ;;  %v863_v0 = vld [vmem:[%s1084_s3 + $0x8] sm:$0xff]   ;;  %v864_v1 = vld [vmem:[%s1084_s3] sm:$0xff]  }
  0x15   :  { %758 = vmatpush3.bf16.msra.mxu1 %v833_v19  ;;  %v672_v15 = vld [vmem:[%s1085_s2] ss:$0 sm:$0xff] }
  0x16   :  { %759 = vmatprep.subr.bf16.mxu1 %v836_v22 }
  0x17   :  { %738 = vmatpush3.bf16.msra.mxu0 %v835_v21 }
  0x18   :  { %739 = vmatprep.subr.bf16.mxu0 %v838_v24 }
  0x19   :  { %760 = vmatpush3.bf16.msra.mxu1 %v837_v23 }
  0x1a   :  { %761 = vmatprep.subr.bf16.mxu1 %v840_v26 }
  0x1b   :  { %740 = vmatpush3.bf16.msra.mxu0 %v839_v25 }
  0x1c   :  { %741 = vmatprep.subr.bf16.mxu0 %v842_v28  ;;  %v723_v28 = vld [vmem:[%s1086_s4] ss:$0 sm:$0xff] }
  0x1d   :  { %762 = vmatpush3.bf16.msra.mxu1 %v841_v27 }
  0x1e   :  { %763 = vmatprep.subr.bf16.mxu1 %v844_v30 }
  0x1f   :  { %742 = vmatpush3.bf16.msra.mxu0 %v843_v29 }
  0x20   :  { %771 = vmatprep.subr.bf16.mxu0 %v846_v36 }
  0x21   :  { %764 = vmatpush3.bf16.msra.mxu1 %v845_v33 }
  0x22   :  { %471 = vmatmul.mubr.bf16.vlgmr.msra.gmra.mxu0 %v28_v35  ;;  %798 = vmatprep.subr.bf16.mxu1 %v865_v44 }
  0x23   :  { %772 = vmatpush3.bf16.msra.mxu0 %v847_v39  ;;  %550 = vmatprep.mubr.bf16.mxu0 %v33_v54 }
  0x24   :  { %511 = vmatmul.mubr.bf16.vlgmr.msra.gmra.mxu1 %v30_v41  ;;  %773 = vmatprep.subr.bf16.mxu0 %v848_v42 }
  0x25   :  { %800 = vmatprep.mubr.msk.bf16.mxu1 %vm866_vm0, %v865_v44  ;;  %799 = vmatpush3.bf16.msra.mxu1 %v862_v52 }
  0x26   :  { %804 = vmatprep.subr.bf16.mxu1 %v865_v44 }
  0x27   :  { %774 = vmatpush3.bf16.msra.mxu0 %v849_v43 }
  0x28   :  { %775 = vmatprep.subr.bf16.mxu0 %v850_v45 }
  0x2b   :  { %776 = vmatpush3.bf16.msra.mxu0 %v851_v46 }
  0x2c   :  { %777 = vmatprep.subr.bf16.mxu0 %v852_v47  ;;  %801 = vmatmul.mubr.msk.bf16.vlgmr.msra.gmra.mxu1 %vm434_vm1, %v34_v57 }
  0x2d   :  { %808 = vmatprep.mubr.msk.bf16.mxu1 %vm866_vm0, %v865_v44  ;;  %805 = vmatpush3.bf16.msra.mxu1 %v863_v0 }
  0x2e   :  { %806 = vmatprep.subr.bf16.mxu1 %v865_v44 }
  0x2f   :  { %778 = vmatpush3.bf16.msra.mxu0 %v853_v48 }
  0x30   :  { %779 = vmatprep.subr.bf16.mxu0 %v854_v49 }
  0x31   :  { %807 = vmatpush3.bf16.msra.mxu1 %v864_v1 }
  0x33   :  { %780 = vmatpush3.bf16.msra.mxu0 %v855_v50 }
  0x34   :  { %781 = vmatprep.subr.bf16.mxu0 %v856_v51 }
  0x37   :  { %782 = vmatpush3.bf16.msra.mxu0 %v857_v56 }
  0x38   :  { %783 = vmatprep.subr.bf16.mxu0 %v858_v58 }
  0x3b   :  { %784 = vmatpush3.bf16.msra.mxu0 %v859_v59 }
  0x3c   :  { %785 = vmatprep.subr.bf16.mxu0 %v860_v60 }
  0x3f   :  { %786 = vmatpush3.bf16.msra.mxu0 %v861_v61 }
  0x42   :  { %551 = vmatmul.mubr.bf16.vlgmr.msra.gmra.mxu0 %v32_v63 }
  0xe2   :  { %v743_v2 = vpop.f32.mrf.mxu0 }
  0xe4   :  { %v744_v3 = vpop.f32.mrf.mxu0  ;;  %v765_v4 = vpop.f32.mrf.mxu1 }
  0xe5   :  { %v745_v14 = vadd.f32 %v744_v3, %v743_v2 }
  0xe6   :  { %v746_v5 = vpop.f32.mrf.mxu0  ;;  %v766_v6 = vpop.f32.mrf.mxu1 }
  0xe7   :  { %v473_v16 = vadd.f32 %v745_v14, %v672_v15  ;;  %v767_v17 = vadd.f32 %v766_v6, %v765_v4 }
  0xe8   :  { %v747_v7 = vpop.f32.mrf.mxu0  ;;  %v768_v8 = vpop.f32.mrf.mxu1 }
  0xe9   :  { %v513_v20 = vadd.f32 %v767_v17, %v473_v16 }
  0xea   :  { %v769_v9 = vpop.f32.mrf.mxu1 }
  0xec   :  { %v592_v10 = vpop.f32.mrf.mxu1 }
  0xee   :  { %v802_v11 = vpop.f32.mrf.mxu1 }
  0xf0   :  { %v595_v12 = vpop.f32.mrf.mxu1 }
  0xf2   :  { %v803_v13 = vpop.f32.mrf.mxu1 }
 0x102   :  { %v787_v18 = vpop.f32.mrf.mxu0 }
 0x104   :  { %v788_v19 = vpop.f32.mrf.mxu0 }
 0x105   :  { %v789_v21 = vadd.f32 %v788_v19, %v787_v18 }
 0x106   :  { %v790_v22 = vpop.f32.mrf.mxu0 }
 0x107   :  { %v553_v23 = vadd.f32 %v789_v21, %v513_v20 }
 0x108   :  { %v791_v24 = vpop.f32.mrf.mxu0 }
 0x109   :  { %v593_v25 = vadd.f32 %v592_v10, %v553_v23 }
 0x10b   :  { %v598_v26 = vmax.f32 %v593_v25, 0.0 }
 0x10d   :  { %v599_v27 = vpack.c.bf16 %v598_v26, %v598_v26 }
 0x10f   :  { %809 = vmatmul.mubr.msk.bf16.vlgmr.msra.gmra.mxu1 %vm623_vm2, %v599_v27 }
 0x1cf   :  { %v661_v29 = vpop.f32.mrf.mxu1 }
 0x1d0   :  { %v662_v30 = vadd.f32 %v723_v28, %v661_v29 }
 0x1d1   :  { %v810_v31 = vpop.f32.mrf.mxu1 }
 0x1d2   :  { %667 = vst [vmem:[%s1087_s5] sm:$0xff] %v662_v30 }
 0x1d3   :  { %v664_v32 = vpop.f32.mrf.mxu1 }
 0x1d5   :  { %v811_v33 = vpop.f32.mrf.mxu1 }

</bundles_post_ra>
